<compile_context>
chip_gen: v5e
topology: v5e:2x2
jax: 0.10.0
libtpu: 0.0.40
codegen_flags: <defaults>
</compile_context>

<pallas_src>
import jax
import jax.numpy as jnp
import numpy as np
from jax.experimental import pallas as pl
from jax.experimental.pallas import tpu as pltpu


def _sigmoid(x):
    # Stable sigmoid; tanh lands on the EUP slot (VALU stays free).
    return 0.5 * (jnp.tanh(0.5 * x) + 1.0)


# ---------------------------------------------------------------------------
# Kernel
# ---------------------------------------------------------------------------
def lstm_decoder_kernel(x_ref, attn_ref,
                        wih_cat_ref, b_cat_ref,
                        whh2_ref,
                        wfc1_ref, bfc1_ref,
                        wfc2_ref, bfc2_ref,
                        ft_ref, zm_ref):
    """LSTMDecoder.forward for one batch tile:
       cell[0](x, (h0=0, c0=attn)) -> (h1, c1)
       cell[1](x, (h1, c1))        -> (h2, c2)
       outputs['ft'] = midfc[0](h1) ; outputs['zm'] = midfc[1](h2)
    PyTorch gate order: i, f, g, o.  Weights arrive pre-transposed, bf16."""
    x = x_ref[...]          # (TB, H) f32
    attn = attn_ref[...]    # (TB, H) f32  (== c0 of the first cell)
    H = x.shape[1]

    x_bf = x.astype(jnp.bfloat16)

    # One fused MXU pass for both cells' x-contributions: (TB, 8H), f32 accum.
    # b_cat already holds (bias_ih + bias_hh) for both cells.
    g_cat = jnp.dot(x_bf, wih_cat_ref[...],
                    preferred_element_type=jnp.float32) + b_cat_ref[...]

    # ---- LSTMCell 'ft': h0 == 0, so the W_hh @ h0 term vanishes.
    i1 = _sigmoid(g_cat[:, 0 * H:1 * H])
    f1 = _sigmoid(g_cat[:, 1 * H:2 * H])
    gg1 = jnp.tanh(g_cat[:, 2 * H:3 * H])
    o1 = _sigmoid(g_cat[:, 3 * H:4 * H])
    c1 = f1 * attn + i1 * gg1
    h1 = o1 * jnp.tanh(c1)
    h1_bf = h1.astype(jnp.bfloat16)

    # ---- LSTMCell 'zm': carries (h1, c1).
    g2 = (g_cat[:, 4 * H:8 * H]
          + jnp.dot(h1_bf, whh2_ref[...], preferred_element_type=jnp.float32))
    i2 = _sigmoid(g2[:, 0 * H:1 * H])
    f2 = _sigmoid(g2[:, 1 * H:2 * H])
    gg2 = jnp.tanh(g2[:, 2 * H:3 * H])
    o2 = _sigmoid(g2[:, 3 * H:4 * H])
    c2 = f2 * c1 + i2 * gg2
    h2 = o2 * jnp.tanh(c2)

    # ---- midfc heads (lane-dense (TB, H) outputs)
    ft_ref[...] = (jnp.dot(h1_bf, wfc1_ref[...],
                           preferred_element_type=jnp.float32) + bfc1_ref[...])
    zm_ref[...] = (jnp.dot(h2.astype(jnp.bfloat16), wfc2_ref[...],
                           preferred_element_type=jnp.float32) + bfc2_ref[...])


# ---------------------------------------------------------------------------
# Parameters
# ---------------------------------------------------------------------------
def init_params(key, hidden_size):
    """PyTorch-layout params, nn.LSTMCell / nn.Linear default init
    (uniform(-1/sqrt(H), 1/sqrt(H)))."""
    H = hidden_size
    k = 1.0 / np.sqrt(H)
    keys = jax.random.split(key, 12)
    u = lambda kk, shape: jax.random.uniform(kk, shape, jnp.float32, -k, k)
    p = {}
    for c in range(2):  # cells 'ft', 'zm'
        base = c * 4
        p[f"wih{c}"] = u(keys[base + 0], (4 * H, H))
        p[f"whh{c}"] = u(keys[base + 1], (4 * H, H))
        p[f"bih{c}"] = u(keys[base + 2], (4 * H,))
        p[f"bhh{c}"] = u(keys[base + 3], (4 * H,))
    for c in range(2):  # midfc Linear layers
        p[f"wfc{c}"] = u(keys[8 + 2 * c], (H, H))
        p[f"bfc{c}"] = u(keys[9 + 2 * c], (H,))
    return p


def prepare_decoder_params(params):
    """One-time re-layout for the kernel (do NOT call per forward):
       - transpose weights to (H, 4H)/(H, H) row-major for x @ W
       - concatenate both cells' W_ih into one (H, 8H) matrix
       - fold bias_ih + bias_hh; keep biases f32, weights bf16."""
    H = params["wih0"].shape[1]
    prep = {
        "wih_cat": jnp.concatenate([params["wih0"].T, params["wih1"].T],
                                   axis=1).astype(jnp.bfloat16),        # (H, 8H)
        "b_cat": jnp.concatenate([params["bih0"] + params["bhh0"],
                                  params["bih1"] + params["bhh1"]]
                                 ).reshape(1, 8 * H).astype(jnp.float32),
        "whh2": params["whh1"].T.astype(jnp.bfloat16),                  # (H, 4H)
        "wfc1": params["wfc0"].T.astype(jnp.bfloat16),                  # (H, H)
        "bfc1": params["bfc0"].reshape(1, H).astype(jnp.float32),
        "wfc2": params["wfc1"].T.astype(jnp.bfloat16),
        "bfc2": params["bfc1"].reshape(1, H).astype(jnp.float32),
    }
    return jax.tree.map(jnp.asarray, prep)


# ---------------------------------------------------------------------------
# Wrapper
# ---------------------------------------------------------------------------
def top_merge_decoder_forward(hidden, attn_out, prep):
    """Pallas-backed equivalent of TopMergeModel's decoder stage:
       result = LSTMDecoder(hidden, attn_out) -> {'ft': (B,H), 'zm': (B,H)}"""
    B, H = hidden.shape
    assert H % 128 == 0, "gate slicing requires hidden_size % 128 == 0 (true for 768)"

    TB = 8 if B % 8 == 0 else B          # batch tile (sublane-aligned when possible)
    grid = (B // TB,)

    act_spec = pl.BlockSpec((TB, H), lambda i: (i, 0))

    def const_spec(arr):                 # weights resident across the batch grid
        nd = arr.ndim
        return pl.BlockSpec(arr.shape, lambda i, _nd=nd: (0,) * _nd)

    weight_args = (prep["wih_cat"], prep["b_cat"], prep["whh2"],
                   prep["wfc1"], prep["bfc1"], prep["wfc2"], prep["bfc2"])

    # VMEM budget: 2x (double-buffered) weights + activation/output tiles + slack,
    # floored at 32 MiB, capped at 64 MiB so it is valid on v7x physical VMEM.
    weight_bytes = sum(int(np.prod(w.shape)) * np.dtype(w.dtype).itemsize
                       for w in weight_args)
    act_bytes = TB * H * 4
    vmem_limit = 2 * (weight_bytes + 4 * act_bytes) + (8 << 20)
    vmem_limit = int(min(max(vmem_limit, 32 << 20), 64 << 20))

    ft, zm = pl.pallas_call(
        lstm_decoder_kernel,
        out_shape=(jax.ShapeDtypeStruct((B, H), jnp.float32),
                   jax.ShapeDtypeStruct((B, H), jnp.float32)),
        grid_spec=pltpu.PrefetchScalarGridSpec(
            num_scalar_prefetch=0,
            grid=grid,
            in_specs=[act_spec, act_spec] + [const_spec(w) for w in weight_args],
            out_specs=[act_spec, act_spec],
        ),
        compiler_params=pltpu.CompilerParams(
            dimension_semantics=("parallel",),
            vmem_limit_bytes=vmem_limit,
        ),
    )(hidden, attn_out, *weight_args)
    return {"ft": ft, "zm": zm}


# ---------------------------------------------------------------------------
# Pure-JAX references (for verification)
# ---------------------------------------------------------------------------
def _reference_forward(hidden, attn_out, params, weight_dtype=jnp.float32):
    """LSTMDecoder semantics in plain JAX.  weight_dtype=float32 reproduces the
    PyTorch math; weight_dtype=bfloat16 mirrors the kernel's quantization."""
    H = hidden.shape[1]
    wd = weight_dtype

    def mm(a, w):  # a @ w.T with the kernel's dtype policy
        return jnp.dot(a.astype(wd), w.T.astype(wd),
                       preferred_element_type=jnp.float32)

    def cell(x, h, c, wih, whh, bih, bhh):
        g = mm(x, wih) + mm(h, whh) + bih + bhh
        i = _sigmoid(g[:, 0 * H:1 * H])
        f = _sigmoid(g[:, 1 * H:2 * H])
        gg = jnp.tanh(g[:, 2 * H:3 * H])
        o = _sigmoid(g[:, 3 * H:4 * H])
        cn = f * c + i * gg
        return o * jnp.tanh(cn), cn

    h0 = jnp.zeros_like(hidden)
    h1, c1 = cell(hidden, h0, attn_out,
                  params["wih0"], params["whh0"], params["bih0"], params["bhh0"])
    h2, _ = cell(hidden, h1, c1,
                 params["wih1"], params["whh1"], params["bih1"], params["bhh1"])
    ft = mm(h1, params["wfc0"]) + params["bfc0"]
    zm = mm(h2, params["wfc1"]) + params["bfc1"]
    return {"ft": ft, "zm": zm}


# ---------------------------------------------------------------------------
if __name__ == "__main__":
    B, H = 8, 128  # small stand-ins for (batch_size, hidden_size=768); H % 128 == 0

    key = jax.random.PRNGKey(0)
    k_x, k_a, k_p = jax.random.split(key, 3)
    hidden = jax.random.normal(k_x, (B, H), jnp.float32)    # BERT pooled output (post-dropout)
    attn_out = jax.random.normal(k_a, (B, H), jnp.float32)  # Attention(v, v, v) output
    params = init_params(k_p, H)
    prep = prepare_decoder_params(params)                   # one-time re-layout / bf16 cast

    out = top_merge_decoder_forward(hidden, attn_out, prep)
    jax.block_until_ready(out)

    # Tight check against a reference with the same bf16 weight policy.
    ref_bf16 = _reference_forward(hidden, attn_out, params, weight_dtype=jnp.bfloat16)
    # Loose check against full-f32 (PyTorch-semantics) reference: bf16 weight error only.
    ref_f32 = _reference_forward(hidden, attn_out, params, weight_dtype=jnp.float32)

    for name in ("ft", "zm"):
        np.testing.assert_allclose(np.asarray(out[name]), np.asarray(ref_bf16[name]),
                                   rtol=2e-3, atol=2e-3)
        np.testing.assert_allclose(np.asarray(out[name]), np.asarray(ref_f32[name]),
                                   rtol=8e-2, atol=8e-2)
    print("KERNEL_OK")
</pallas_src>

<mosaic_0001>
module attributes {stable_mosaic.version = 11 : i64} {
  func.func @lstm_decoder_kernel(%arg0: i32, %arg1: memref<8x128xf32, #tpu.memory_space<vmem>>, %arg2: memref<8x128xf32, #tpu.memory_space<vmem>>, %arg3: memref<128x1024xbf16, #tpu.memory_space<vmem>>, %arg4: memref<1x1024xf32, #tpu.memory_space<vmem>>, %arg5: memref<128x512xbf16, #tpu.memory_space<vmem>>, %arg6: memref<128x128xbf16, #tpu.memory_space<vmem>>, %arg7: memref<1x128xf32, #tpu.memory_space<vmem>>, %arg8: memref<128x128xbf16, #tpu.memory_space<vmem>>, %arg9: memref<1x128xf32, #tpu.memory_space<vmem>>, %arg10: memref<8x128xf32, #tpu.memory_space<vmem>>, %arg11: memref<8x128xf32, #tpu.memory_space<vmem>>) attributes {dimension_semantics = [#tpu.dimension_semantics<parallel>], iteration_bounds = array<i64: 1>, scalar_prefetch = 0 : i64, scratch_operands = 0 : i64, tpu.core_type = #tpu.core_type<tc>, window_params = [{transform_indices = @transform_0, window_bounds = array<i64: 8, 128>}, {transform_indices = @transform_1, window_bounds = array<i64: 8, 128>}, {pipeline_mode = #tpu.pipeline_mode<synchronous>, transform_indices = @transform_2, window_bounds = array<i64: 128, 1024>}, {pipeline_mode = #tpu.pipeline_mode<synchronous>, transform_indices = @transform_3, window_bounds = array<i64: 1, 1024>}, {pipeline_mode = #tpu.pipeline_mode<synchronous>, transform_indices = @transform_4, window_bounds = array<i64: 128, 512>}, {pipeline_mode = #tpu.pipeline_mode<synchronous>, transform_indices = @transform_5, window_bounds = array<i64: 128, 128>}, {pipeline_mode = #tpu.pipeline_mode<synchronous>, transform_indices = @transform_6, window_bounds = array<i64: 1, 128>}, {pipeline_mode = #tpu.pipeline_mode<synchronous>, transform_indices = @transform_7, window_bounds = array<i64: 128, 128>}, {pipeline_mode = #tpu.pipeline_mode<synchronous>, transform_indices = @transform_8, window_bounds = array<i64: 1, 128>}, {transform_indices = @transform_9, window_bounds = array<i64: 8, 128>}, {transform_indices = @transform_10, window_bounds = array<i64: 8, 128>}]} {
    %c0 = arith.constant 0 : index
    %c0_0 = arith.constant 0 : index
    %0 = vector.load %arg1[%c0, %c0_0] : memref<8x128xf32, #tpu.memory_space<vmem>>, vector<8x128xf32>
    %c0_1 = arith.constant 0 : index
    %c0_2 = arith.constant 0 : index
    %1 = vector.load %arg2[%c0_1, %c0_2] : memref<8x128xf32, #tpu.memory_space<vmem>>, vector<8x128xf32>
    %2 = arith.truncf %0 : vector<8x128xf32> to vector<8x128xbf16>
    %c0_3 = arith.constant 0 : index
    %c0_4 = arith.constant 0 : index
    %3 = vector.load %arg3[%c0_3, %c0_4] : memref<128x1024xbf16, #tpu.memory_space<vmem>>, vector<128x1024xbf16>
    %cst = arith.constant dense<0.000000e+00> : vector<8x1024xf32>
    %4 = tpu.matmul %2, %3, %cst {dimension_numbers = #tpu.dot_dimension_numbers<[1], [0], [0], [1], [0, 0, 1, 1], [], []>} : vector<8x128xbf16>, vector<128x1024xbf16>, vector<8x1024xf32> -> vector<8x1024xf32>
    %c0_5 = arith.constant 0 : index
    %c0_6 = arith.constant 0 : index
    %5 = vector.load %arg4[%c0_5, %c0_6] : memref<1x1024xf32, #tpu.memory_space<vmem>>, vector<1x1024xf32>
    %6 = vector.broadcast %5 : vector<1x1024xf32> to vector<8x1024xf32>
    %7 = arith.addf %4, %6 : vector<8x1024xf32>
    %8 = vector.extract_strided_slice %7 {offsets = [0, 0], sizes = [8, 128], strides = [1, 1]} : vector<8x1024xf32> to vector<8x128xf32>
    %cst_7 = arith.constant 5.000000e-01 : f32
    %9 = vector.broadcast %cst_7 : f32 to vector<8x128xf32>
    %10 = arith.mulf %9, %8 : vector<8x128xf32>
    %11 = math.tanh %10 : vector<8x128xf32>
    %cst_8 = arith.constant 1.000000e+00 : f32
    %12 = vector.broadcast %cst_8 : f32 to vector<8x128xf32>
    %13 = arith.addf %11, %12 : vector<8x128xf32>
    %cst_9 = arith.constant 5.000000e-01 : f32
    %14 = vector.broadcast %cst_9 : f32 to vector<8x128xf32>
    %15 = arith.mulf %14, %13 : vector<8x128xf32>
    %16 = vector.extract_strided_slice %7 {offsets = [0, 128], sizes = [8, 128], strides = [1, 1]} : vector<8x1024xf32> to vector<8x128xf32>
    %cst_10 = arith.constant 5.000000e-01 : f32
    %17 = vector.broadcast %cst_10 : f32 to vector<8x128xf32>
    %18 = arith.mulf %17, %16 : vector<8x128xf32>
    %19 = math.tanh %18 : vector<8x128xf32>
    %cst_11 = arith.constant 1.000000e+00 : f32
    %20 = vector.broadcast %cst_11 : f32 to vector<8x128xf32>
    %21 = arith.addf %19, %20 : vector<8x128xf32>
    %cst_12 = arith.constant 5.000000e-01 : f32
    %22 = vector.broadcast %cst_12 : f32 to vector<8x128xf32>
    %23 = arith.mulf %22, %21 : vector<8x128xf32>
    %24 = vector.extract_strided_slice %7 {offsets = [0, 256], sizes = [8, 128], strides = [1, 1]} : vector<8x1024xf32> to vector<8x128xf32>
    %25 = math.tanh %24 : vector<8x128xf32>
    %26 = vector.extract_strided_slice %7 {offsets = [0, 384], sizes = [8, 128], strides = [1, 1]} : vector<8x1024xf32> to vector<8x128xf32>
    %cst_13 = arith.constant 5.000000e-01 : f32
    %27 = vector.broadcast %cst_13 : f32 to vector<8x128xf32>
    %28 = arith.mulf %27, %26 : vector<8x128xf32>
    %29 = math.tanh %28 : vector<8x128xf32>
    %cst_14 = arith.constant 1.000000e+00 : f32
    %30 = vector.broadcast %cst_14 : f32 to vector<8x128xf32>
    %31 = arith.addf %29, %30 : vector<8x128xf32>
    %cst_15 = arith.constant 5.000000e-01 : f32
    %32 = vector.broadcast %cst_15 : f32 to vector<8x128xf32>
    %33 = arith.mulf %32, %31 : vector<8x128xf32>
    %34 = arith.mulf %23, %1 : vector<8x128xf32>
    %35 = arith.mulf %15, %25 : vector<8x128xf32>
    %36 = arith.addf %34, %35 : vector<8x128xf32>
    %37 = math.tanh %36 : vector<8x128xf32>
    %38 = arith.mulf %33, %37 : vector<8x128xf32>
    %39 = arith.truncf %38 : vector<8x128xf32> to vector<8x128xbf16>
    %40 = vector.extract_strided_slice %7 {offsets = [0, 512], sizes = [8, 512], strides = [1, 1]} : vector<8x1024xf32> to vector<8x512xf32>
    %c0_16 = arith.constant 0 : index
    %c0_17 = arith.constant 0 : index
    %41 = vector.load %arg5[%c0_16, %c0_17] : memref<128x512xbf16, #tpu.memory_space<vmem>>, vector<128x512xbf16>
    %cst_18 = arith.constant dense<0.000000e+00> : vector<8x512xf32>
    %42 = tpu.matmul %39, %41, %cst_18 {dimension_numbers = #tpu.dot_dimension_numbers<[1], [0], [0], [1], [0, 0, 1, 1], [], []>} : vector<8x128xbf16>, vector<128x512xbf16>, vector<8x512xf32> -> vector<8x512xf32>
    %43 = arith.addf %40, %42 : vector<8x512xf32>
    %44 = vector.extract_strided_slice %43 {offsets = [0, 0], sizes = [8, 128], strides = [1, 1]} : vector<8x512xf32> to vector<8x128xf32>
    %cst_19 = arith.constant 5.000000e-01 : f32
    %45 = vector.broadcast %cst_19 : f32 to vector<8x128xf32>
    %46 = arith.mulf %45, %44 : vector<8x128xf32>
    %47 = math.tanh %46 : vector<8x128xf32>
    %cst_20 = arith.constant 1.000000e+00 : f32
    %48 = vector.broadcast %cst_20 : f32 to vector<8x128xf32>
    %49 = arith.addf %47, %48 : vector<8x128xf32>
    %cst_21 = arith.constant 5.000000e-01 : f32
    %50 = vector.broadcast %cst_21 : f32 to vector<8x128xf32>
    %51 = arith.mulf %50, %49 : vector<8x128xf32>
    %52 = vector.extract_strided_slice %43 {offsets = [0, 128], sizes = [8, 128], strides = [1, 1]} : vector<8x512xf32> to vector<8x128xf32>
    %cst_22 = arith.constant 5.000000e-01 : f32
    %53 = vector.broadcast %cst_22 : f32 to vector<8x128xf32>
    %54 = arith.mulf %53, %52 : vector<8x128xf32>
    %55 = math.tanh %54 : vector<8x128xf32>
    %cst_23 = arith.constant 1.000000e+00 : f32
    %56 = vector.broadcast %cst_23 : f32 to vector<8x128xf32>
    %57 = arith.addf %55, %56 : vector<8x128xf32>
    %cst_24 = arith.constant 5.000000e-01 : f32
    %58 = vector.broadcast %cst_24 : f32 to vector<8x128xf32>
    %59 = arith.mulf %58, %57 : vector<8x128xf32>
    %60 = vector.extract_strided_slice %43 {offsets = [0, 256], sizes = [8, 128], strides = [1, 1]} : vector<8x512xf32> to vector<8x128xf32>
    %61 = math.tanh %60 : vector<8x128xf32>
    %62 = vector.extract_strided_slice %43 {offsets = [0, 384], sizes = [8, 128], strides = [1, 1]} : vector<8x512xf32> to vector<8x128xf32>
    %cst_25 = arith.constant 5.000000e-01 : f32
    %63 = vector.broadcast %cst_25 : f32 to vector<8x128xf32>
    %64 = arith.mulf %63, %62 : vector<8x128xf32>
    %65 = math.tanh %64 : vector<8x128xf32>
    %cst_26 = arith.constant 1.000000e+00 : f32
    %66 = vector.broadcast %cst_26 : f32 to vector<8x128xf32>
    %67 = arith.addf %65, %66 : vector<8x128xf32>
    %cst_27 = arith.constant 5.000000e-01 : f32
    %68 = vector.broadcast %cst_27 : f32 to vector<8x128xf32>
    %69 = arith.mulf %68, %67 : vector<8x128xf32>
    %70 = arith.mulf %59, %36 : vector<8x128xf32>
    %71 = arith.mulf %51, %61 : vector<8x128xf32>
    %72 = arith.addf %70, %71 : vector<8x128xf32>
    %73 = math.tanh %72 : vector<8x128xf32>
    %74 = arith.mulf %69, %73 : vector<8x128xf32>
    %c0_28 = arith.constant 0 : index
    %c0_29 = arith.constant 0 : index
    %75 = vector.load %arg6[%c0_28, %c0_29] : memref<128x128xbf16, #tpu.memory_space<vmem>>, vector<128x128xbf16>
    %cst_30 = arith.constant dense<0.000000e+00> : vector<8x128xf32>
    %76 = tpu.matmul %39, %75, %cst_30 {dimension_numbers = #tpu.dot_dimension_numbers<[1], [0], [0], [1], [0, 0, 1, 1], [], []>} : vector<8x128xbf16>, vector<128x128xbf16>, vector<8x128xf32> -> vector<8x128xf32>
    %c0_31 = arith.constant 0 : index
    %c0_32 = arith.constant 0 : index
    %77 = vector.load %arg7[%c0_31, %c0_32] : memref<1x128xf32, #tpu.memory_space<vmem>>, vector<1x128xf32>
    %78 = vector.broadcast %77 : vector<1x128xf32> to vector<8x128xf32>
    %79 = arith.addf %76, %78 : vector<8x128xf32>
    %c0_33 = arith.constant 0 : index
    %c0_34 = arith.constant 0 : index
    %80 = vector.load %arg10[%c0_33, %c0_34] : memref<8x128xf32, #tpu.memory_space<vmem>>, vector<8x128xf32>
    tpu.vector_store %arg10[%c0_33, %c0_34], %79 {strides = array<i32>} : memref<8x128xf32, #tpu.memory_space<vmem>>, vector<8x128xf32>,
    %81 = arith.truncf %74 : vector<8x128xf32> to vector<8x128xbf16>
    %c0_35 = arith.constant 0 : index
    %c0_36 = arith.constant 0 : index
    %82 = vector.load %arg8[%c0_35, %c0_36] : memref<128x128xbf16, #tpu.memory_space<vmem>>, vector<128x128xbf16>
    %cst_37 = arith.constant dense<0.000000e+00> : vector<8x128xf32>
    %83 = tpu.matmul %81, %82, %cst_37 {dimension_numbers = #tpu.dot_dimension_numbers<[1], [0], [0], [1], [0, 0, 1, 1], [], []>} : vector<8x128xbf16>, vector<128x128xbf16>, vector<8x128xf32> -> vector<8x128xf32>
    %c0_38 = arith.constant 0 : index
    %c0_39 = arith.constant 0 : index
    %84 = vector.load %arg9[%c0_38, %c0_39] : memref<1x128xf32, #tpu.memory_space<vmem>>, vector<1x128xf32>
    %85 = vector.broadcast %84 : vector<1x128xf32> to vector<8x128xf32>
    %86 = arith.addf %83, %85 : vector<8x128xf32>
    %c0_40 = arith.constant 0 : index
    %c0_41 = arith.constant 0 : index
    %87 = vector.load %arg11[%c0_40, %c0_41] : memref<8x128xf32, #tpu.memory_space<vmem>>, vector<8x128xf32>
    tpu.vector_store %arg11[%c0_40, %c0_41], %86 {strides = array<i32>} : memref<8x128xf32, #tpu.memory_space<vmem>>, vector<8x128xf32>,
    return
  }
  func.func @transform_0(%arg0: i32) -> (i32, i32) {
    %c0_i32 = arith.constant 0 : i32
    %c0_i32_0 = arith.constant 0 : i32
    return %arg0, %c0_i32 : i32, i32
  }
  func.func @transform_1(%arg0: i32) -> (i32, i32) {
    %c0_i32 = arith.constant 0 : i32
    %c0_i32_0 = arith.constant 0 : i32
    return %arg0, %c0_i32 : i32, i32
  }
  func.func @transform_2(%arg0: i32) -> (i32, i32) {
    %c0_i32 = arith.constant 0 : i32
    %c0_i32_0 = arith.constant 0 : i32
    %c0_i32_1 = arith.constant 0 : i32
    return %c0_i32, %c0_i32_0 : i32, i32
  }
  func.func @transform_3(%arg0: i32) -> (i32, i32) {
    %c0_i32 = arith.constant 0 : i32
    %c0_i32_0 = arith.constant 0 : i32
    %c0_i32_1 = arith.constant 0 : i32
    return %c0_i32, %c0_i32_0 : i32, i32
  }
  func.func @transform_4(%arg0: i32) -> (i32, i32) {
    %c0_i32 = arith.constant 0 : i32
    %c0_i32_0 = arith.constant 0 : i32
    %c0_i32_1 = arith.constant 0 : i32
    return %c0_i32, %c0_i32_0 : i32, i32
  }
  func.func @transform_5(%arg0: i32) -> (i32, i32) {
    %c0_i32 = arith.constant 0 : i32
    %c0_i32_0 = arith.constant 0 : i32
    %c0_i32_1 = arith.constant 0 : i32
    return %c0_i32, %c0_i32_0 : i32, i32
  }
  func.func @transform_6(%arg0: i32) -> (i32, i32) {
    %c0_i32 = arith.constant 0 : i32
    %c0_i32_0 = arith.constant 0 : i32
    %c0_i32_1 = arith.constant 0 : i32
    return %c0_i32, %c0_i32_0 : i32, i32
  }
  func.func @transform_7(%arg0: i32) -> (i32, i32) {
    %c0_i32 = arith.constant 0 : i32
    %c0_i32_0 = arith.constant 0 : i32
    %c0_i32_1 = arith.constant 0 : i32
    return %c0_i32, %c0_i32_0 : i32, i32
  }
  func.func @transform_8(%arg0: i32) -> (i32, i32) {
    %c0_i32 = arith.constant 0 : i32
    %c0_i32_0 = arith.constant 0 : i32
    %c0_i32_1 = arith.constant 0 : i32
    return %c0_i32, %c0_i32_0 : i32, i32
  }
  func.func @transform_9(%arg0: i32) -> (i32, i32) {
    %c0_i32 = arith.constant 0 : i32
    %c0_i32_0 = arith.constant 0 : i32
    return %arg0, %c0_i32 : i32, i32
  }
  func.func @transform_10(%arg0: i32) -> (i32, i32) {
    %c0_i32 = arith.constant 0 : i32
    %c0_i32_0 = arith.constant 0 : i32
    return %arg0, %c0_i32 : i32, i32
  }
}

</mosaic_0001>

<bundles_post_ra>
// kernel: tpu_custom_call.1
= control target key start
LH: loop header
LB: loop body
LE: loop exit
PB: predicated region body
PF: predicated region fallthrough
CT: control target
= control target key end

     0   :  { %16 = vsyncpa [#allocation3], 0  ;;  %s2092_s0 = inlined_call_operand.hbm [shape: f32[8,128], index: 0, kind: input, shape index: {}]   ;;  %s2093_s1 = inlined_call_operand.hbm [shape: f32[8,128], index: 1, kind: input, shape index: {}]   ;;  %s2094_s2 = inlined_call_operand.hbm [shape: bf16[128,1024], index: 2, kind: input, shape index: {}]   ;;  %s2095_s3 = inlined_call_operand.hbm [shape: f32[1,1024], index: 3, kind: input, shape index: {}]   ;;  %s2096_s4 = inlined_call_operand.hbm [shape: bf16[128,512], index: 4, kind: input, shape index: {}]   ;;  %s2097_s5 = inlined_call_operand.hbm [shape: bf16[128,128], index: 5, kind: input, shape index: {}]   ;;  %s2098_s6 = inlined_call_operand.vmem [shape: f32[1,128], index: 6, kind: input, shape index: {}]   ;;  %s2099_s7 = inlined_call_operand.hbm [shape: bf16[128,128], index: 7, kind: input, shape index: {}]   ;;  %s2100_s8 = inlined_call_operand.vmem [shape: f32[1,128], index: 8, kind: input, shape index: {}]   ;;  %s2101_s9 = inlined_call_operand.hbm [shape: f32[8,128], index: 9, kind: output, shape index: {0}]   ;;  %s2102_s10 = inlined_call_operand.hbm [shape: f32[8,128], index: 10, kind: output, shape index: {1}]  }
   0x1   :  { %17 = vsyncpa [#allocation6], 0 }
   0x2   :  { %18 = vsyncpa [#allocation9], 0 }
   0x3   :  { %19 = vsyncpa [#allocation12], 0 }
   0x4   :  { %20 = vsyncpa [#allocation4], 0  ;;  %s38_s15 = sshll.u32 %s2093_s1, 4  ;;  %s39_s15 = int_to_ptr.hbm [resolvable:$true] %s38_s15 }
   0x5   :  { %21 = vsyncpa [#allocation16], 0  ;;  %s1959_s16 = smov [#allocation5]   ;;  %s62_s20 = sshll.u32 %s2095_s3, 4  ;;  %s63_s20 = int_to_ptr.hbm [resolvable:$true] %s62_s20 }
   0x6   :  { %s40_s17 = sshll.u32 %s1959_s16, 4  ;;  %s1960_s21 = smov [#allocation8]   ;;  %s41_s17 = int_to_ptr.vmem [resolvable:$true] %s40_s17 }
   0x7   :  { %43 = dma.hbm_to_vmem [thread:$0]  %s39_s15, 128, %s41_s17, [#allocation6]  }
   0x8   :  { %s64_s22 = sshll.u32 %s1960_s21, 4  ;;  %s85_s25 = sshll.u32 %s2097_s5, 4  ;;  %s65_s22 = int_to_ptr.vmem [resolvable:$true] %s64_s22  ;;  %s86_s25 = int_to_ptr.hbm [resolvable:$true] %s85_s25 }
   0x9   :  { %67 = dma.hbm_to_vmem [thread:$0]  %s63_s20, 128, %s65_s22, [#allocation9]  }
   0xa   :  { %s1961_s1 = smov [#allocation11]   ;;  %s27_s29 = sshll.u32 %s2092_s0, 4  ;;  %s28_s29 = int_to_ptr.hbm [resolvable:$true] %s27_s29 }
   0xb   :  { %s87_s26 = sshll.u32 %s1961_s1, 4  ;;  %s1962_s30 = smov 64   ;;  %s88_s26 = int_to_ptr.vmem [resolvable:$true] %s87_s26 }
   0xc   :  { %s1963_s3 = smov 4   ;;  %s1964_s11 = smov [#allocation2]  }
   0xd   :  { %93 = dma.hbm_to_vmem [thread:$0]  %s86_s25, 1024, %s88_s26, [#allocation12], %s1962_s30, %s1962_s30, %s1963_s3  }
   0xe   :  { %s29_s12 = sshll.u32 %s1964_s11, 4  ;;  %s48_s14 = sshll.u32 %s2094_s2, 4  ;;  %s30_s12 = int_to_ptr.vmem [resolvable:$true] %s29_s12  ;;  %s49_s14 = int_to_ptr.hbm [resolvable:$true] %s48_s14 }
   0xf   :  { %32 = dma.hbm_to_vmem [thread:$0]  %s28_s29, 128, %s30_s12, [#allocation3]  }
  0x10   :  { %s1965_s15 = smov [#allocation7]   ;;  %s72_s18 = sshll.u32 %s2096_s4, 4  ;;  %s73_s18 = int_to_ptr.hbm [resolvable:$true] %s72_s18 }
  0x11   :  { %s50_s16 = sshll.u32 %s1965_s15, 4  ;;  %s1966_s19 = smov 512   ;;  %s51_s16 = int_to_ptr.vmem [resolvable:$true] %s50_s16 }
  0x12   :  { %s1967_s20 = smov 32   ;;  %s1968_s21 = smov [#allocation10]  }
  0x13   :  { %56 = dma.hbm_to_vmem [thread:$0]  %s49_s14, 8192, %s51_s16, [#allocation6], %s1966_s19, %s1966_s19, %s1967_s20  }
  0x14   :  { %s74_s22 = sshll.u32 %s1968_s21, 4  ;;  %s1969_s23 = smov 256   ;;  %s75_s22 = int_to_ptr.vmem [resolvable:$true] %s74_s22 }
  0x15   :  { %s1970_s24 = smov 16   ;;  %s100_s1 = sshll.u32 %s2099_s7, 4  ;;  %s101_s1 = int_to_ptr.hbm [resolvable:$true] %s100_s1 }
  0x16   :  { %80 = dma.hbm_to_vmem [thread:$0]  %s73_s18, 4096, %s75_s22, [#allocation9], %s1969_s23, %s1969_s23, %s1970_s24  }
  0x17   :  { %s1971_s26 = smov [#allocation13]  }
  0x18   :  { %s102_s27 = sshll.u32 %s1971_s26, 4  ;;  %s103_s27 = int_to_ptr.vmem [resolvable:$true] %s102_s27 }
  0x19   :  { %108 = dma.hbm_to_vmem [thread:$0]  %s101_s1, 1024, %s103_s27, [#allocation12], %s1962_s30, %s1962_s30, %s1963_s3  }
  0x1a   :  { %1947 = dma.done.wait [#allocation3], 128  }
  0x1b   :  { %1948 = vsyncadd [#allocation3], 4294967168 }
  0x1c   :  { %1949 = dma.done.wait [#allocation6], 8320  }
  0x1d   :  { %1950 = vsyncadd [#allocation6], 4294958976 }
  0x1e   :  { %1951 = dma.done.wait [#allocation9], 4224  }
  0x1f   :  { %1952 = vsyncadd [#allocation9], 4294963072 }
  0x20   :  { %1953 = dma.done.wait [#allocation12], 2048  }
  0x21   :  { %1954 = vsyncadd [#allocation12], 4294965248  ;;  %v1360_v0 = vld [vmem:[#allocation7 + $0x1c0] sm:$0xf]  ;;  %v1638_v2 = vld [vmem:[#allocation7 + $0x1c4] sm:$0xf] }
  0x22   :  { %v1642_v1 = vld [vmem:[#allocation7 + $0x1dc] sm:$0xf0]  ;;  %v1362_v4 = vld [vmem:[#allocation7 + $0x1e0] sm:$0xf0]  ;;  %v1368_v5 = vld [vmem:[#allocation7 + $0x1c8] sm:$0xf] }
  0x23   :  { %v1361_v3 = vor.u32 %v1642_v1, %v1360_v0  ;;  %v1643_v6 = vld [vmem:[#allocation7 + $0x1e4] sm:$0xf0]  ;;  %v1365_v7 = vor.u32 %v1638_v2, %v1362_v4  ;;  %v1639_v9 = vld [vmem:[#allocation7 + $0x1cc] sm:$0xf]  ;;  %v1328_v11 = vld [vmem:[#allocation7 + $0x180] sm:$0xf] }
  0x24   :  { %v1369_v8 = vor.u32 %v1643_v6, %v1368_v5  ;;  %v1370_v10 = vld [vmem:[#allocation7 + $0x1e8] sm:$0xf0]  ;;  %v1634_v13 = vld [vmem:[#allocation7 + $0x19c] sm:$0xf0]  ;;  %v1630_v14 = vld [vmem:[#allocation7 + $0x184] sm:$0xf] }
  0x25   :  { %544 = vmatpush.bf16.msra.mxu0 %v1361_v3  ;;  %v1373_v12 = vor.u32 %v1639_v9, %v1370_v10  ;;  %v1330_v15 = vld [vmem:[#allocation7 + $0x1a0] sm:$0xf0]  ;;  %557 = vmatpush.bf16.msra.mxu1 %v1365_v7  ;;  %v1329_v16 = vor.u32 %v1634_v13, %v1328_v11  ;;  %v1336_v18 = vld [vmem:[#allocation7 + $0x188] sm:$0xf]  ;;  %v1631_v20 = vld [vmem:[#allocation7 + $0x18c] sm:$0xf] }
  0x26   :  { %570 = vmatpush.bf16.msra.mxu2 %v1369_v8  ;;  %v1333_v17 = vor.u32 %v1630_v14, %v1330_v15  ;;  %v1635_v19 = vld [vmem:[#allocation7 + $0x1a4] sm:$0xf0]  ;;  %v1338_v22 = vld [vmem:[#allocation7 + $0x1a8] sm:$0xf0]  ;;  %v1296_v23 = vld [vmem:[#allocation7 + $0x140] sm:$0xf] }
  0x27   :  { %583 = vmatpush.bf16.msra.mxu3 %v1373_v12  ;;  %v1337_v21 = vor.u32 %v1635_v19, %v1336_v18  ;;  %v1626_v24 = vld [vmem:[#allocation7 + $0x15c] sm:$0xf0]  ;;  %v1341_v25 = vor.u32 %v1631_v20, %v1338_v22  ;;  %v1622_v26 = vld [vmem:[#allocation7 + $0x144] sm:$0xf]  ;;  %v1304_v28 = vld [vmem:[#allocation7 + $0x148] sm:$0xf] }
  0x28   :  { %v1298_v27 = vld [vmem:[#allocation7 + $0x160] sm:$0xf0]  ;;  %v1297_v29 = vor.u32 %v1626_v24, %v1296_v23  ;;  %v1627_v30 = vld [vmem:[#allocation7 + $0x164] sm:$0xf0]  ;;  %v1623_v31 = vld [vmem:[#allocation7 + $0x14c] sm:$0xf] }
  0x29   :  { %545 = vmatpush.bf16.msra.mxu0 %v1329_v16  ;;  %v1306_v32 = vld [vmem:[#allocation7 + $0x168] sm:$0xf0]  ;;  %558 = vmatpush.bf16.msra.mxu1 %v1333_v17  ;;  %v1301_v33 = vor.u32 %v1622_v26, %v1298_v27  ;;  %v1305_v34 = vor.u32 %v1627_v30, %v1304_v28  ;;  %v1264_v35 = vld [vmem:[#allocation7 + $0x100] sm:$0xf]  ;;  %v1614_v37 = vld [vmem:[#allocation7 + $0x104] sm:$0xf] }
  0x2a   :  { %571 = vmatpush.bf16.msra.mxu2 %v1337_v21  ;;  %v1618_v36 = vld [vmem:[#allocation7 + $0x11c] sm:$0xf0]  ;;  %v1309_v38 = vor.u32 %v1623_v31, %v1306_v32  ;;  %v1266_v39 = vld [vmem:[#allocation7 + $0x120] sm:$0xf0]  ;;  %v1272_v40 = vld [vmem:[#allocation7 + $0x108] sm:$0xf] }
  0x2b   :  { %584 = vmatpush.bf16.msra.mxu3 %v1341_v25  ;;  %v1619_v41 = vld [vmem:[#allocation7 + $0x124] sm:$0xf0]  ;;  %v1615_v42 = vld [vmem:[#allocation7 + $0x10c] sm:$0xf]  ;;  %v1265_v44 = vor.u32 %v1618_v36, %v1264_v35  ;;  %v1269_v45 = vor.u32 %v1614_v37, %v1266_v39  ;;  %v1232_v47 = vld [vmem:[#allocation7 + $0xc0] sm:$0xf] }
  0x2c   :  { %v1274_v43 = vld [vmem:[#allocation7 + $0x128] sm:$0xf0]  ;;  %v1273_v46 = vor.u32 %v1619_v41, %v1272_v40  ;;  %v1610_v48 = vld [vmem:[#allocation7 + $0xdc] sm:$0xf0]  ;;  %v1606_v49 = vld [vmem:[#allocation7 + $0xc4] sm:$0xf] }
  0x2d   :  { %546 = vmatpush.bf16.msra.mxu0 %v1297_v29  ;;  %559 = vmatpush.bf16.msra.mxu1 %v1301_v33  ;;  %v1277_v50 = vor.u32 %v1615_v42, %v1274_v43  ;;  %v1234_v51 = vld [vmem:[#allocation7 + $0xe0] sm:$0xf0]  ;;  %v1240_v52 = vld [vmem:[#allocation7 + $0xc8] sm:$0xf]  ;;  %v1607_v54 = vld [vmem:[#allocation7 + $0xcc] sm:$0xf]  ;;  %v1233_v56 = vor.u32 %v1610_v48, %v1232_v47 }
  0x2e   :  { %572 = vmatpush.bf16.msra.mxu2 %v1305_v34  ;;  %v1611_v53 = vld [vmem:[#allocation7 + $0xe4] sm:$0xf0]  ;;  %v1242_v55 = vld [vmem:[#allocation7 + $0xe8] sm:$0xf0]  ;;  %v1237_v57 = vor.u32 %v1606_v49, %v1234_v51  ;;  %v1200_v59 = vld [vmem:[#allocation7 + $0x80] sm:$0xf] }
  0x2f   :  { %585 = vmatpush.bf16.msra.mxu3 %v1309_v38  ;;  %v1241_v58 = vor.u32 %v1611_v53, %v1240_v52  ;;  %v1602_v60 = vld [vmem:[#allocation7 + $0x9c] sm:$0xf0]  ;;  %v1598_v61 = vld [vmem:[#allocation7 + $0x84] sm:$0xf]  ;;  %v1245_v62 = vor.u32 %v1607_v54, %v1242_v55  ;;  %v1208_v0 = vld [vmem:[#allocation7 + $0x88] sm:$0xf] }
  0x30   :  { %v1202_v63 = vld [vmem:[#allocation7 + $0xa0] sm:$0xf0]  ;;  %v1603_v1 = vld [vmem:[#allocation7 + $0xa4] sm:$0xf0]  ;;  %v1599_v2 = vld [vmem:[#allocation7 + $0x8c] sm:$0xf]  ;;  %v1201_v4 = vor.u32 %v1602_v60, %v1200_v59 }
  0x31   :  { %547 = vmatpush.bf16.msra.mxu0 %v1265_v44  ;;  %560 = vmatpush.bf16.msra.mxu1 %v1269_v45  ;;  %v1210_v3 = vld [vmem:[#allocation7 + $0xa8] sm:$0xf0]  ;;  %v1205_v5 = vor.u32 %v1598_v61, %v1202_v63  ;;  %v1209_v6 = vor.u32 %v1603_v1, %v1208_v0  ;;  %v1168_v7 = vld [vmem:[#allocation7 + $0x40] sm:$0xf]  ;;  %v1590_v9 = vld [vmem:[#allocation7 + $0x44] sm:$0xf] }
  0x32   :  { %573 = vmatpush.bf16.msra.mxu2 %v1273_v46  ;;  %v1594_v8 = vld [vmem:[#allocation7 + $0x5c] sm:$0xf0]  ;;  %v1213_v10 = vor.u32 %v1599_v2, %v1210_v3  ;;  %v1170_v11 = vld [vmem:[#allocation7 + $0x60] sm:$0xf0]  ;;  %v1176_v12 = vld [vmem:[#allocation7 + $0x48] sm:$0xf] }
  0x33   :  { %586 = vmatpush.bf16.msra.mxu3 %v1277_v50  ;;  %v1595_v13 = vld [vmem:[#allocation7 + $0x64] sm:$0xf0]  ;;  %v1591_v14 = vld [vmem:[#allocation7 + $0x4c] sm:$0xf]  ;;  %v1169_v16 = vor.u32 %v1594_v8, %v1168_v7  ;;  %v1136_v17 = vld [vmem:[#allocation7] sm:$0xf]  ;;  %v1173_v18 = vor.u32 %v1590_v9, %v1170_v11 }
  0x34   :  { %v1178_v15 = vld [vmem:[#allocation7 + $0x68] sm:$0xf0]  ;;  %v1177_v19 = vor.u32 %v1595_v13, %v1176_v12  ;;  %v1586_v20 = vld [vmem:[#allocation7 + $0x1c] sm:$0xf0]  ;;  %v1582_v21 = vld [vmem:[#allocation7 + $0x4] sm:$0xf] }
  0x35   :  { %548 = vmatpush.bf16.msra.mxu0 %v1233_v56  ;;  %561 = vmatpush.bf16.msra.mxu1 %v1237_v57  ;;  %v1138_v22 = vld [vmem:[#allocation7 + $0x20] sm:$0xf0]  ;;  %v1181_v23 = vor.u32 %v1591_v14, %v1178_v15  ;;  %v1144_v24 = vld [vmem:[#allocation7 + $0x8] sm:$0xf]  ;;  %v1583_v26 = vld [vmem:[#allocation7 + $0xc] sm:$0xf]  ;;  %v1137_v30 = vor.u32 %v1586_v20, %v1136_v17 }
  0x36   :  { %574 = vmatpush.bf16.msra.mxu2 %v1241_v58  ;;  %v1587_v25 = vld [vmem:[#allocation7 + $0x24] sm:$0xf0]  ;;  %v1146_v27 = vld [vmem:[#allocation7 + $0x28] sm:$0xf0]  ;;  %v1376_v28 = vld [vmem:[#allocation7 + $0x1d0] sm:$0xf]  ;;  %v1141_v34 = vor.u32 %v1582_v21, %v1138_v22 }
  0x37   :  { %587 = vmatpush.bf16.msra.mxu3 %v1245_v62  ;;  %v1644_v29 = vld [vmem:[#allocation7 + $0x1ec] sm:$0xf0]  ;;  %v1640_v32 = vld [vmem:[#allocation7 + $0x1d4] sm:$0xf]  ;;  %v1145_v35 = vor.u32 %v1587_v25, %v1144_v24  ;;  %v1149_v36 = vor.u32 %v1583_v26, %v1146_v27  ;;  %v1384_v39 = vld [vmem:[#allocation7 + $0x1d8] sm:$0xf] }
  0x38   :  { %v139_v31 = vld [vmem:[#allocation2] sm:$0xff]  ;;  %v1377_v37 = vor.u32 %v1644_v29, %v1376_v28  ;;  %v1645_v40 = vld [vmem:[#allocation7 + $0x1f4] sm:$0xf0]  ;;  %v1641_v44 = vld [vmem:[#allocation7 + $0x1dc] sm:$0xf]  ;;  %s1105_s3 = sshll.u32 %s2101_s9, 4  ;;  %s1106_s3 = int_to_ptr.hbm [resolvable:$true] %s1105_s3 }
  0x39   :  { %549 = vmatpush.bf16.msra.mxu0 %v1201_v4  ;;  %562 = vmatpush.bf16.msra.mxu1 %v1205_v5  ;;  %v1378_v33 = vld [vmem:[#allocation7 + $0x1f0] sm:$0xf0]  ;;  %v1344_v38 = vld [vmem:[#allocation7 + $0x190] sm:$0xf]  ;;  %v2056_v41 = vpack.c.bf16 %v139_v31, %v139_v31  ;;  %v1386_v45 = vld [vmem:[#allocation7 + $0x1f8] sm:$0xf0]  ;;  %v1385_v48 = vor.u32 %v1645_v40, %v1384_v39 }
  0x3a   :  { %575 = vmatpush.bf16.msra.mxu2 %v1209_v6  ;;  %v1636_v42 = vld [vmem:[#allocation7 + $0x1ac] sm:$0xf0]  ;;  %v1381_v43 = vor.u32 %v1640_v32, %v1378_v33  ;;  %v1632_v46 = vld [vmem:[#allocation7 + $0x194] sm:$0xf]  ;;  %v1389_v51 = vor.u32 %v1641_v44, %v1386_v45  ;;  %v1352_v52 = vld [vmem:[#allocation7 + $0x198] sm:$0xf] }
  0x3b   :  { %588 = vmatpush.bf16.msra.mxu3 %v1213_v10  ;;  %v1346_v47 = vld [vmem:[#allocation7 + $0x1b0] sm:$0xf0]  ;;  %v1345_v49 = vor.u32 %v1636_v42, %v1344_v38  ;;  %v1312_v50 = vld [vmem:[#allocation7 + $0x150] sm:$0xf]  ;;  %v1637_v53 = vld [vmem:[#allocation7 + $0x1b4] sm:$0xf0] }
  0x3c   :  { %v1628_v54 = vld [vmem:[#allocation7 + $0x16c] sm:$0xf0]  ;;  %v1349_v55 = vor.u32 %v1632_v46, %v1346_v47  ;;  %v1633_v56 = vld [vmem:[#allocation7 + $0x19c] sm:$0xf]  ;;  %v1624_v58 = vld [vmem:[#allocation7 + $0x154] sm:$0xf]  ;;  %v1353_v60 = vor.u32 %v1637_v53, %v1352_v52 }
  0x3d   :  { %550 = vmatpush.bf16.msra.mxu0 %v1169_v16  ;;  %563 = vmatpush.bf16.msra.mxu1 %v1173_v18  ;;  %v1354_v57 = vld [vmem:[#allocation7 + $0x1b8] sm:$0xf0]  ;;  %v1314_v59 = vld [vmem:[#allocation7 + $0x170] sm:$0xf0]  ;;  %v1313_v61 = vor.u32 %v1628_v54, %v1312_v50  ;;  %v1280_v62 = vld [vmem:[#allocation7 + $0x110] sm:$0xf] }
  0x3e   :  { %576 = vmatpush.bf16.msra.mxu2 %v1177_v19  ;;  %v1357_v63 = vor.u32 %v1633_v56, %v1354_v57  ;;  %v1320_v0 = vld [vmem:[#allocation7 + $0x158] sm:$0xf]  ;;  %v1620_v2 = vld [vmem:[#allocation7 + $0x12c] sm:$0xf0]  ;;  %v1317_v3 = vor.u32 %v1624_v58, %v1314_v59  ;;  %v1625_v4 = vld [vmem:[#allocation7 + $0x15c] sm:$0xf] }
  0x3f   :  { %589 = vmatpush.bf16.msra.mxu3 %v1181_v23  ;;  %v1629_v1 = vld [vmem:[#allocation7 + $0x174] sm:$0xf0]  ;;  %v1322_v5 = vld [vmem:[#allocation7 + $0x178] sm:$0xf0]  ;;  %v1616_v6 = vld [vmem:[#allocation7 + $0x114] sm:$0xf]  ;;  %v1281_v9 = vor.u32 %v1620_v2, %v1280_v62 }
  0x40   :  { %v1282_v7 = vld [vmem:[#allocation7 + $0x130] sm:$0xf0]  ;;  %v1321_v8 = vor.u32 %v1629_v1, %v1320_v0  ;;  %v1248_v10 = vld [vmem:[#allocation7 + $0xd0] sm:$0xf]  ;;  %v1325_v11 = vor.u32 %v1625_v4, %v1322_v5  ;;  %v1288_v12 = vld [vmem:[#allocation7 + $0x118] sm:$0xf] }
  0x41   :  { %551 = vmatpush.bf16.msra.mxu0 %v1137_v30  ;;  %564 = vmatpush.bf16.msra.mxu1 %v1141_v34  ;;  %v1621_v13 = vld [vmem:[#allocation7 + $0x134] sm:$0xf0]  ;;  %v1612_v14 = vld [vmem:[#allocation7 + $0xec] sm:$0xf0]  ;;  %v1285_v15 = vor.u32 %v1616_v6, %v1282_v7  ;;  %v1617_v16 = vld [vmem:[#allocation7 + $0x11c] sm:$0xf] }
  0x42   :  { %577 = vmatpush.bf16.msra.mxu2 %v1145_v35  ;;  %v1290_v17 = vld [vmem:[#allocation7 + $0x138] sm:$0xf0]  ;;  %v1608_v18 = vld [vmem:[#allocation7 + $0xd4] sm:$0xf]  ;;  %v1216_v20 = vld [vmem:[#allocation7 + $0x90] sm:$0xf]  ;;  %v1289_v22 = vor.u32 %v1621_v13, %v1288_v12  ;;  %v1249_v23 = vor.u32 %v1612_v14, %v1248_v10 }
  0x43   :  { %590 = vmatpush.bf16.msra.mxu3 %v1149_v36  ;;  %v1250_v19 = vld [vmem:[#allocation7 + $0xf0] sm:$0xf0]  ;;  %v1604_v21 = vld [vmem:[#allocation7 + $0xac] sm:$0xf0]  ;;  %v1293_v24 = vor.u32 %v1617_v16, %v1290_v17  ;;  %v1256_v25 = vld [vmem:[#allocation7 + $0xd8] sm:$0xf] }
  0x44   :  { %552 = vmatmul.bf16.vlgmr.msra.gmra.mxu0 %v2056_v41  ;;  %565 = vmatmul.bf16.vlgmr.msra.gmra.mxu1 %v2056_v41  ;;  %v1613_v26 = vld [vmem:[#allocation7 + $0xf4] sm:$0xf0]  ;;  %v1609_v27 = vld [vmem:[#allocation7 + $0xdc] sm:$0xf]  ;;  %v1253_v28 = vor.u32 %v1608_v18, %v1250_v19  ;;  %v1600_v30 = vld [vmem:[#allocation7 + $0x94] sm:$0xf]  ;;  %v1217_v33 = vor.u32 %v1604_v21, %v1216_v20 }
  0x45   :  { %596 = vmatpush.bf16.msrb.mxu0 %v1377_v37  ;;  %609 = vmatpush.bf16.msrb.mxu1 %v1381_v43  ;;  %v1258_v29 = vld [vmem:[#allocation7 + $0xf8] sm:$0xf0]  ;;  %v1218_v31 = vld [vmem:[#allocation7 + $0xb0] sm:$0xf0]  ;;  %v1257_v32 = vor.u32 %v1613_v26, %v1256_v25  ;;  %v1184_v34 = vld [vmem:[#allocation7 + $0x50] sm:$0xf] }
  0x46   :  { %578 = vmatmul.bf16.vlgmr.msra.gmra.mxu2 %v2056_v41  ;;  %591 = vmatmul.bf16.vlgmr.msra.gmra.mxu3 %v2056_v41  ;;  %v1261_v35 = vor.u32 %v1609_v27, %v1258_v29  ;;  %v1224_v36 = vld [vmem:[#allocation7 + $0x98] sm:$0xf]  ;;  %v1596_v38 = vld [vmem:[#allocation7 + $0x6c] sm:$0xf0]  ;;  %v1221_v39 = vor.u32 %v1600_v30, %v1218_v31  ;;  %v1601_v40 = vld [vmem:[#allocation7 + $0x9c] sm:$0xf] }
  0x47   :  { %622 = vmatpush.bf16.msrb.mxu2 %v1385_v48  ;;  %635 = vmatpush.bf16.msrb.mxu3 %v1389_v51  ;;  %v1605_v37 = vld [vmem:[#allocation7 + $0xb4] sm:$0xf0]  ;;  %v1226_v42 = vld [vmem:[#allocation7 + $0xb8] sm:$0xf0]  ;;  %v1592_v43 = vld [vmem:[#allocation7 + $0x54] sm:$0xf]  ;;  %v1185_v47 = vor.u32 %v1596_v38, %v1184_v34 }
  0x48   :  { %v1186_v44 = vld [vmem:[#allocation7 + $0x70] sm:$0xf0]  ;;  %v1152_v45 = vld [vmem:[#allocation7 + $0x10] sm:$0xf]  ;;  %v1225_v46 = vor.u32 %v1605_v37, %v1224_v36  ;;  %v1192_v50 = vld [vmem:[#allocation7 + $0x58] sm:$0xf] }
  0x49   :  { %597 = vmatpush.bf16.msrb.mxu0 %v1345_v49  ;;  %610 = vmatpush.bf16.msrb.mxu1 %v1349_v55  ;;  %v1588_v48 = vld [vmem:[#allocation7 + $0x2c] sm:$0xf0]  ;;  %v1229_v49 = vor.u32 %v1601_v40, %v1226_v42  ;;  %v1597_v51 = vld [vmem:[#allocation7 + $0x74] sm:$0xf0]  ;;  %v1504_v52 = vld [vmem:[#allocation10 + $0xe0] sm:$0xf]  ;;  %v1189_v53 = vor.u32 %v1592_v43, %v1186_v44 }
  0x4a   :  { %v1593_v54 = vld [vmem:[#allocation7 + $0x5c] sm:$0xf]  ;;  %v1676_v56 = vld [vmem:[#allocation10 + $0xec] sm:$0xf0]  ;;  %v1584_v57 = vld [vmem:[#allocation7 + $0x14] sm:$0xf]  ;;  %v1193_v59 = vor.u32 %v1597_v51, %v1192_v50 }
  0x4b   :  { %623 = vmatpush.bf16.msrb.mxu2 %v1353_v60  ;;  %636 = vmatpush.bf16.msrb.mxu3 %v1357_v63  ;;  %v1194_v55 = vld [vmem:[#allocation7 + $0x78] sm:$0xf0]  ;;  %v1154_v58 = vld [vmem:[#allocation7 + $0x30] sm:$0xf0]  ;;  %v1153_v60 = vor.u32 %v1588_v48, %v1152_v45  ;;  %v1160_v62 = vld [vmem:[#allocation7 + $0x18] sm:$0xf]  ;;  %v1505_v0 = vor.u32 %v1676_v56, %v1504_v52 }
  0x4c   :  { %v1589_v63 = vld [vmem:[#allocation7 + $0x34] sm:$0xf0]  ;;  %v1157_v1 = vor.u32 %v1584_v57, %v1154_v58  ;;  %v1585_v2 = vld [vmem:[#allocation7 + $0x1c] sm:$0xf]  ;;  %v1488_v4 = vld [vmem:[#allocation10 + $0xc0] sm:$0xf] }
  0x4d   :  { %598 = vmatpush.bf16.msrb.mxu0 %v1313_v61  ;;  %611 = vmatpush.bf16.msrb.mxu1 %v1317_v3  ;;  %v1197_v61 = vor.u32 %v1593_v54, %v1194_v55  ;;  %v1162_v3 = vld [vmem:[#allocation7 + $0x38] sm:$0xf0]  ;;  %v1672_v5 = vld [vmem:[#allocation10 + $0xcc] sm:$0xf0]  ;;  %v1161_v6 = vor.u32 %v1589_v63, %v1160_v62  ;;  %v1456_v12 = vld [vmem:[#allocation10 + $0x80] sm:$0xf] }
  0x4e   :  { %v1165_v7 = vor.u32 %v1585_v2, %v1162_v3  ;;  %v1668_v10 = vld [vmem:[#allocation10 + $0xac] sm:$0xf0]  ;;  %v1506_v16 = vld [vmem:[#allocation10 + $0xf0] sm:$0xf0]  ;;  %v1512_v17 = vld [vmem:[#allocation10 + $0xe8] sm:$0xf] }
  0x4f   :  { %624 = vmatpush.bf16.msrb.mxu2 %v1321_v8  ;;  %637 = vmatpush.bf16.msrb.mxu3 %v1325_v11  ;;  %v1489_v8 = vor.u32 %v1672_v5, %v1488_v4  ;;  %v1664_v13 = vld [vmem:[#allocation10 + $0x8c] sm:$0xf0]  ;;  %v1677_v19 = vld [vmem:[#allocation10 + $0xf4] sm:$0xf0]  ;;  %v1675_v20 = vld [vmem:[#allocation10 + $0xec] sm:$0xf] }
  0x50   :  { %v1457_v14 = vor.u32 %v1664_v13, %v1456_v12  ;;  %v1514_v21 = vld [vmem:[#allocation10 + $0xf8] sm:$0xf0]  ;;  %v1660_v25 = vld [vmem:[#allocation10 + $0x6c] sm:$0xf0]  ;;  %v1670_v27 = vld [vmem:[#allocation10 + $0xc4] sm:$0xf] }
  0x51   :  { %599 = vmatpush.bf16.msrb.mxu0 %v1281_v9  ;;  %612 = vmatpush.bf16.msrb.mxu1 %v1285_v15  ;;  %v1472_v9 = vld [vmem:[#allocation10 + $0xa0] sm:$0xf]  ;;  %v1674_v15 = vld [vmem:[#allocation10 + $0xe4] sm:$0xf]  ;;  %v1673_v30 = vld [vmem:[#allocation10 + $0xd4] sm:$0xf0] }
  0x52   :  { %v1473_v11 = vor.u32 %v1668_v10, %v1472_v9  ;;  %v1509_v18 = vor.u32 %v1674_v15, %v1506_v16  ;;  %v1671_v31 = vld [vmem:[#allocation10 + $0xcc] sm:$0xf]  ;;  %v1656_v36 = vld [vmem:[#allocation10 + $0x4c] sm:$0xf0]  ;;  %v1666_v38 = vld [vmem:[#allocation10 + $0xa4] sm:$0xf] }
  0x53   :  { %625 = vmatpush.bf16.msrb.mxu2 %v1289_v22  ;;  %638 = vmatpush.bf16.msrb.mxu3 %v1293_v24  ;;  %v1513_v22 = vor.u32 %v1677_v19, %v1512_v17  ;;  %v1440_v24 = vld [vmem:[#allocation10 + $0x60] sm:$0xf]  ;;  %v1480_v42 = vld [vmem:[#allocation10 + $0xa8] sm:$0xf]  ;;  %v1669_v43 = vld [vmem:[#allocation10 + $0xb4] sm:$0xf0] }
  0x54   :  { %v1441_v26 = vor.u32 %v1660_v25, %v1440_v24  ;;  %v1667_v44 = vld [vmem:[#allocation10 + $0xac] sm:$0xf]  ;;  %v1481_v45 = vor.u32 %v1669_v43, %v1480_v42  ;;  %v1408_v48 = vld [vmem:[#allocation10 + $0x20] sm:$0xf]  ;;  %v1662_v51 = vld [vmem:[#allocation10 + $0x84] sm:$0xf] }
  0x55   :  { %600 = vmatpush.bf16.msrb.mxu0 %v1249_v23  ;;  %613 = vmatpush.bf16.msrb.mxu1 %v1253_v28  ;;  %v1517_v23 = vor.u32 %v1675_v20, %v1514_v21  ;;  %v1496_v28 = vld [vmem:[#allocation10 + $0xc8] sm:$0xf]  ;;  %v1458_v52 = vld [vmem:[#allocation10 + $0x90] sm:$0xf0]  ;;  %v1665_v55 = vld [vmem:[#allocation10 + $0x94] sm:$0xf0] }
  0x56   :  { %v1461_v54 = vor.u32 %v1662_v51, %v1458_v52  ;;  %v1663_v56 = vld [vmem:[#allocation10 + $0x8c] sm:$0xf]  ;;  %v1466_v58 = vld [vmem:[#allocation10 + $0x98] sm:$0xf0]  ;;  %v1658_v63 = vld [vmem:[#allocation10 + $0x64] sm:$0xf] }
  0x57   :  { %626 = vmatpush.bf16.msrb.mxu2 %v1257_v32  ;;  %639 = vmatpush.bf16.msrb.mxu3 %v1261_v35  ;;  %v1498_v32 = vld [vmem:[#allocation10 + $0xd8] sm:$0xf0]  ;;  %v1424_v35 = vld [vmem:[#allocation10 + $0x40] sm:$0xf]  ;;  %v1661_v3 = vld [vmem:[#allocation10 + $0x74] sm:$0xf0] }
  0x58   :  { %v1501_v34 = vor.u32 %v1671_v31, %v1498_v32  ;;  %v1425_v37 = vor.u32 %v1656_v36, %v1424_v35  ;;  %v1659_v4 = vld [vmem:[#allocation10 + $0x6c] sm:$0xf]  ;;  %v1450_v5 = vld [vmem:[#allocation10 + $0x78] sm:$0xf0]  ;;  %v1654_v9 = vld [vmem:[#allocation10 + $0x44] sm:$0xf] }
  0x59   :  { %601 = vmatpush.bf16.msrb.mxu0 %v1217_v33  ;;  %614 = vmatpush.bf16.msrb.mxu1 %v1221_v39  ;;  %v1497_v33 = vor.u32 %v1673_v30, %v1496_v28  ;;  %v1474_v39 = vld [vmem:[#allocation10 + $0xb0] sm:$0xf0]  ;;  %v1657_v13 = vld [vmem:[#allocation10 + $0x54] sm:$0xf0]  ;;  %v1434_v15 = vld [vmem:[#allocation10 + $0x58] sm:$0xf0] }
  0x5a   :  { %v1477_v40 = vor.u32 %v1666_v38, %v1474_v39  ;;  %v1426_v10 = vld [vmem:[#allocation10 + $0x50] sm:$0xf0]  ;;  %v1650_v19 = vld [vmem:[#allocation10 + $0x24] sm:$0xf]  ;;  %v1416_v21 = vld [vmem:[#allocation10 + $0x28] sm:$0xf] }
  0x5b   :  { %627 = vmatpush.bf16.msrb.mxu2 %v1225_v46  ;;  %640 = vmatpush.bf16.msrb.mxu3 %v1229_v49  ;;  %v1482_v46 = vld [vmem:[#allocation10 + $0xb8] sm:$0xf0]  ;;  %v1652_v49 = vld [vmem:[#allocation10 + $0x2c] sm:$0xf0]  ;;  %v1429_v12 = vor.u32 %v1654_v9, %v1426_v10  ;;  %v1410_v20 = vld [vmem:[#allocation10 + $0x30] sm:$0xf0] }
  0x5c   :  { %v1409_v50 = vor.u32 %v1652_v49, %v1408_v48  ;;  %v1651_v24 = vld [vmem:[#allocation10 + $0x2c] sm:$0xf]  ;;  %v1418_v25 = vld [vmem:[#allocation10 + $0x38] sm:$0xf0]  ;;  %v1394_v30 = vld [vmem:[#allocation10 + $0x10] sm:$0xf0] }
  0x5d   :  { %602 = vmatpush.bf16.msrb.mxu0 %v1185_v47  ;;  %615 = vmatpush.bf16.msrb.mxu1 %v1189_v53  ;;  %v1485_v47 = vor.u32 %v1667_v44, %v1482_v46  ;;  %v1464_v53 = vld [vmem:[#allocation10 + $0x88] sm:$0xf]  ;;  %v2066_v28 = vld [vmem:[#allocation8] sm:$0xff]  ;;  %v1682_v39 = vld [vmem:[#allocation11 + $0x20] sm:$0xff]  ;;  %s1973_s5 = smov [#allocation15]   ;;  %s1116_s16 = sshll.u32 %s2102_s10, 4  ;;  %s1117_s16 = int_to_ptr.hbm [resolvable:$true] %s1116_s16 }
  0x5e   :  { %v1465_v57 = vor.u32 %v1665_v55, %v1464_v53  ;;  %v1400_v31 = vld [vmem:[#allocation10 + $0x8] sm:$0xf]  ;;  %v1402_v35 = vld [vmem:[#allocation10 + $0x18] sm:$0xf0]  ;;  %v208_v36 = vperm.slane %v2066_v28, 0  ;;  %v1680_v48 = vld [vmem:[#allocation11 + $0x10] sm:$0xff] }
  0x5f   :  { %628 = vmatpush.bf16.msrb.mxu2 %v1193_v59  ;;  %641 = vmatpush.bf16.msrb.mxu3 %v1197_v61  ;;  %v1469_v59 = vor.u32 %v1663_v56, %v1466_v58  ;;  %v1648_v61 = vld [vmem:[#allocation10 + $0xc] sm:$0xf0]  ;;  %v1681_v43 = vld [vmem:[#allocation11 + $0x18] sm:$0xff]  ;;  %v211_v51 = vperm.slane %v2066_v28, 3  ;;  %v1679_v53 = vld [vmem:[#allocation11 + $0x8] sm:$0xff]  ;;  %s1114_s13 = sshll.u32 %s1973_s5, 4  ;;  %s1115_s13 = int_to_ptr.vmem [resolvable:$true] %s1114_s13 }
  0x61   :  { %603 = vmatpush.bf16.msrb.mxu0 %v1153_v60  ;;  %616 = vmatpush.bf16.msrb.mxu1 %v1157_v1  ;;  %v1392_v60 = vld [vmem:[#allocation10] sm:$0xf]  ;;  %v1448_v1 = vld [vmem:[#allocation10 + $0x68] sm:$0xf] }
  0x62   :  { %v1393_v62 = vor.u32 %v1648_v61, %v1392_v60  ;;  %v1678_v61 = vld [vmem:[#allocation11] sm:$0xff] }
  0x63   :  { %629 = vmatpush.bf16.msrb.mxu2 %v1161_v6  ;;  %642 = vmatpush.bf16.msrb.mxu3 %v1165_v7  ;;  %v1449_v6 = vor.u32 %v1661_v3, %v1448_v1  ;;  %v1453_v7 = vor.u32 %v1659_v4, %v1450_v5 }
  0x64   :  { %604 = vmatmul.bf16.vlgmr.msrb.gmra.mxu0 %v2056_v41  ;;  %617 = vmatmul.bf16.vlgmr.msrb.gmra.mxu1 %v2056_v41 }
  0x65   :  { %859 = vmatpush.bf16.msra.mxu0 %v1505_v0  ;;  %872 = vmatpush.bf16.msra.mxu1 %v1509_v18  ;;  %v1442_v0 = vld [vmem:[#allocation10 + $0x70] sm:$0xf0] }
  0x66   :  { %630 = vmatmul.bf16.vlgmr.msrb.gmra.mxu2 %v2056_v41  ;;  %643 = vmatmul.bf16.vlgmr.msrb.gmra.mxu3 %v2056_v41  ;;  %v1490_v41 = vld [vmem:[#allocation10 + $0xd0] sm:$0xf0]  ;;  %v1445_v2 = vor.u32 %v1658_v63, %v1442_v0 }
  0x67   :  { %885 = vmatpush.bf16.msra.mxu2 %v1513_v22  ;;  %898 = vmatpush.bf16.msra.mxu3 %v1517_v23  ;;  %v1493_v29 = vor.u32 %v1670_v27, %v1490_v41  ;;  %v1684_v18 = vld [vmem:[#allocation11 + $0x30] sm:$0xff]  ;;  %v1413_v22 = vor.u32 %v1650_v19, %v1410_v20  ;;  %v1653_v23 = vld [vmem:[#allocation10 + $0x34] sm:$0xf0]  ;;  %v1421_v27 = vor.u32 %v1651_v24, %v1418_v25  ;;  %v1683_v41 = vld [vmem:[#allocation11 + $0x28] sm:$0xff] }
  0x68   :  { %v1693_v24 = vld [vmem:[#allocation13 + $0x38] sm:$0xff]  ;;  %v1692_v25 = vld [vmem:[#allocation13 + $0x30] sm:$0xff] }
  0x69   :  { %860 = vmatpush.bf16.msra.mxu0 %v1489_v8  ;;  %873 = vmatpush.bf16.msra.mxu1 %v1493_v29  ;;  %v1685_v8 = vld [vmem:[#allocation11 + $0x38] sm:$0xff]  ;;  %v1646_v29 = vld [vmem:[#allocation10 + $0x4] sm:$0xf] }
  0x6a   :  { %v1397_v32 = vor.u32 %v1646_v29, %v1394_v30  ;;  %v1688_v29 = vld [vmem:[#allocation13 + $0x10] sm:$0xff]  ;;  %v1687_v30 = vld [vmem:[#allocation13 + $0x8] sm:$0xff] }
  0x6b   :  { %886 = vmatpush.bf16.msra.mxu2 %v1497_v33  ;;  %899 = vmatpush.bf16.msra.mxu3 %v1501_v34  ;;  %v1649_v33 = vld [vmem:[#allocation10 + $0x14] sm:$0xf0]  ;;  %v1647_v34 = vld [vmem:[#allocation10 + $0xc] sm:$0xf] }
  0x6c   :  { %v1405_v38 = vor.u32 %v1647_v34, %v1402_v35 }
  0x6d   :  { %861 = vmatpush.bf16.msra.mxu0 %v1473_v11  ;;  %874 = vmatpush.bf16.msra.mxu1 %v1477_v40  ;;  %v1432_v11 = vld [vmem:[#allocation10 + $0x48] sm:$0xf]  ;;  %v209_v40 = vperm.slane %v2066_v28, 1 }
  0x6e   :  { %v1433_v16 = vor.u32 %v1657_v13, %v1432_v11 }
  0x6f   :  { %887 = vmatpush.bf16.msra.mxu2 %v1481_v45  ;;  %900 = vmatpush.bf16.msra.mxu3 %v1485_v47 }
  0x71   :  { %862 = vmatpush.bf16.msra.mxu0 %v1457_v14  ;;  %875 = vmatpush.bf16.msra.mxu1 %v1461_v54  ;;  %v1655_v14 = vld [vmem:[#allocation10 + $0x4c] sm:$0xf] }
  0x72   :  { %v1437_v17 = vor.u32 %v1655_v14, %v1434_v15 }
  0x73   :  { %888 = vmatpush.bf16.msra.mxu2 %v1465_v57  ;;  %901 = vmatpush.bf16.msra.mxu3 %v1469_v59 }
  0x75   :  { %863 = vmatpush.bf16.msra.mxu0 %v1441_v26  ;;  %876 = vmatpush.bf16.msra.mxu1 %v1445_v2  ;;  %v1417_v26 = vor.u32 %v1653_v23, %v1416_v21  ;;  %v140_v2 = vld [vmem:[#allocation5] sm:$0xff] }
  0x77   :  { %889 = vmatpush.bf16.msra.mxu2 %v1449_v6  ;;  %902 = vmatpush.bf16.msra.mxu3 %v1453_v7 }
  0x79   :  { %864 = vmatpush.bf16.msra.mxu0 %v1425_v37  ;;  %877 = vmatpush.bf16.msra.mxu1 %v1429_v12  ;;  %v1401_v37 = vor.u32 %v1649_v33, %v1400_v31  ;;  %v212_v31 = vperm.slane %v2066_v28, 4  ;;  %v1686_v33 = vld [vmem:[#allocation13] sm:$0xff] }
  0x7b   :  { %890 = vmatpush.bf16.msra.mxu2 %v1433_v16  ;;  %903 = vmatpush.bf16.msra.mxu3 %v1437_v17 }
  0x7d   :  { %865 = vmatpush.bf16.msra.mxu0 %v1409_v50  ;;  %878 = vmatpush.bf16.msra.mxu1 %v1413_v22  ;;  %v210_v50 = vperm.slane %v2066_v28, 2 }
  0x7f   :  { %891 = vmatpush.bf16.msra.mxu2 %v1417_v26  ;;  %904 = vmatpush.bf16.msra.mxu3 %v1421_v27  ;;  %v1691_v26 = vld [vmem:[#allocation13 + $0x28] sm:$0xff]  ;;  %v1690_v27 = vld [vmem:[#allocation13 + $0x20] sm:$0xff] }
  0x81   :  { %866 = vmatpush.bf16.msra.mxu0 %v1393_v62  ;;  %879 = vmatpush.bf16.msra.mxu1 %v1397_v32  ;;  %v213_v32 = vperm.slane %v2066_v28, 5 }
  0x83   :  { %892 = vmatpush.bf16.msra.mxu2 %v1401_v37  ;;  %905 = vmatpush.bf16.msra.mxu3 %v1405_v38 }
  0x85   :  { %1001 = vmatpush.bf16.msrb.mxu0 %v1685_v8  ;;  %1084 = vmatpush.bf16.msrb.mxu1 %v1693_v24 }
  0x89   :  { %1002 = vmatpush.bf16.msrb.mxu0 %v1684_v18  ;;  %1085 = vmatpush.bf16.msrb.mxu1 %v1692_v25 }
  0x8d   :  { %1003 = vmatpush.bf16.msrb.mxu0 %v1683_v41  ;;  %1086 = vmatpush.bf16.msrb.mxu1 %v1691_v26  ;;  %v1689_v41 = vld [vmem:[#allocation13 + $0x18] sm:$0xff] }
  0x91   :  { %1004 = vmatpush.bf16.msrb.mxu0 %v1682_v39  ;;  %1087 = vmatpush.bf16.msrb.mxu1 %v1690_v27 }
  0x95   :  { %1005 = vmatpush.bf16.msrb.mxu0 %v1681_v43  ;;  %1088 = vmatpush.bf16.msrb.mxu1 %v1689_v41 }
  0x99   :  { %1006 = vmatpush.bf16.msrb.mxu0 %v1680_v48  ;;  %1089 = vmatpush.bf16.msrb.mxu1 %v1688_v29 }
  0x9d   :  { %1007 = vmatpush.bf16.msrb.mxu0 %v1679_v53  ;;  %1090 = vmatpush.bf16.msrb.mxu1 %v1687_v30 }
  0xa1   :  { %1008 = vmatpush.bf16.msrb.mxu0 %v1678_v61  ;;  %1091 = vmatpush.bf16.msrb.mxu1 %v1686_v33 }
  0xc1   :  { %v553_v42 = vpop.f32.mrf.mxu0  ;;  %v566_v45 = vpop.f32.mrf.mxu1 }
  0xc2   :  { %v554_v44 = vadd.f32 %v553_v42, %v208_v36  ;;  %v567_v46 = vadd.f32 %v566_v45, %v209_v40  ;;  %v214_v40 = vperm.slane %v2066_v28, 6  ;;  %v215_v42 = vperm.slane %v2066_v28, 7  ;;  %v1709_v28 = vld [vmem:[%s2098_s6] ss:$0 sm:$0xff]  ;;  %s1972_s6 = smov [#allocation14]  }
  0xc3   :  { %s1103_s28 = sshll.u32 %s1972_s6, 4  ;;  %s1104_s28 = int_to_ptr.vmem [resolvable:$true] %s1103_s28 }
  0xc4   :  { %v648_v47 = vmul.f32 0.5, %v554_v44  ;;  %v652_v49 = vmul.f32 0.5, %v567_v46 }
  0xc6   :  { %1711 = vtanh.f32 %v648_v47 }
  0xc7   :  { %1713 = vtanh.f32 %v652_v49 }
  0xc9   :  { %v579_v52 = vpop.f32.mrf.mxu2  ;;  %v592_v55 = vpop.f32.mrf.mxu3 }
  0xca   :  { %v580_v54 = vadd.f32 %v579_v52, %v210_v50  ;;  %v555_v56 = vpop.f32.mrf.mxu0  ;;  %v593_v57 = vadd.f32 %v592_v55, %v211_v51  ;;  %v568_v58 = vpop.f32.mrf.mxu1 }
  0xcc   :  { %1715 = vtanh.f32 %v580_v54  ;;  %v1712_v59 = vpop.eup %1711  ;;  %v657_v60 = vmul.f32 0.5, %v593_v57 }
  0xcd   :  { %v1714_v62 = vpop.eup %1713  ;;  %v650_v63 = vadd.f32 1.0, %v1712_v59 }
  0xce   :  { %v654_v0 = vadd.f32 1.0, %v1714_v62  ;;  %1717 = vtanh.f32 %v657_v60 }
  0xcf   :  { %v651_v1 = vmul.f32 0.5, %v650_v63 }
  0xd0   :  { %v655_v3 = vmul.f32 0.5, %v654_v0 }
  0xd1   :  { %v581_v4 = vpop.f32.mrf.mxu2  ;;  %v594_v6 = vpop.f32.mrf.mxu3 }
  0xd2   :  { %v1716_v5 = vpop.eup %1715  ;;  %v661_v7 = vmul.f32 %v655_v3, %v140_v2 }
  0xd3   :  { %v662_v8 = vmul.f32 %v1716_v5, %v651_v1 }
  0xd4   :  { %v1718_v9 = vpop.eup %1717 }
  0xd5   :  { %v2072_v10 = vadd.f32 %v662_v8, %v661_v7  ;;  %v659_v11 = vadd.f32 1.0, %v1718_v9 }
  0xd7   :  { %1719 = vtanh.f32 %v2072_v10  ;;  %v660_v12 = vmul.f32 0.5, %v659_v11 }
  0xdd   :  { %v1720_v13 = vpop.eup %1719 }
  0xde   :  { %v665_v14 = vmul.f32 %v1720_v13, %v660_v12 }
  0xe0   :  { %v666_v15 = vpack.c.bf16 %v665_v14, %v665_v14 }
  0xe1   :  { %v605_v16 = vpop.f32.mrf.mxu0  ;;  %v618_v17 = vpop.f32.mrf.mxu1 }
  0xe2   :  { %867 = vmatmul.bf16.vlgmr.msra.gmra.mxu0 %v666_v15  ;;  %880 = vmatmul.bf16.vlgmr.msra.gmra.mxu1 %v666_v15  ;;  %v606_v34 = vadd.f32 %v605_v16, %v212_v31  ;;  %v619_v35 = vadd.f32 %v618_v17, %v213_v32 }
  0xe3   :  { %893 = vmatmul.bf16.vlgmr.msra.gmra.mxu2 %v666_v15  ;;  %906 = vmatmul.bf16.vlgmr.msra.gmra.mxu3 %v666_v15 }
  0xe9   :  { %v607_v18 = vpop.f32.mrf.mxu0  ;;  %v631_v19 = vpop.f32.mrf.mxu2 }
  0xea   :  { %v620_v20 = vpop.f32.mrf.mxu1  ;;  %v644_v21 = vpop.f32.mrf.mxu3  ;;  %v632_v45 = vadd.f32 %v631_v19, %v214_v40 }
  0xeb   :  { %v645_v46 = vadd.f32 %v644_v21, %v215_v42 }
  0xf1   :  { %v633_v22 = vpop.f32.mrf.mxu2 }
  0xf2   :  { %1009 = vmatmul.bf16.vlgmr.msrb.gmra.mxu0 %v666_v15  ;;  %v646_v23 = vpop.f32.mrf.mxu3 }
 0x15f   :  { %v868_v36 = vpop.f32.mrf.mxu0  ;;  %v881_v37 = vpop.f32.mrf.mxu1 }
 0x160   :  { %v911_v38 = vadd.f32 %v868_v36, %v606_v34  ;;  %v912_v39 = vadd.f32 %v881_v37, %v619_v35 }
 0x162   :  { %v915_v43 = vmul.f32 0.5, %v911_v38  ;;  %v919_v44 = vmul.f32 0.5, %v912_v39 }
 0x164   :  { %1721 = vtanh.f32 %v915_v43 }
 0x165   :  { %1723 = vtanh.f32 %v919_v44 }
 0x166   :  { %v894_v47 = vpop.f32.mrf.mxu2  ;;  %v907_v48 = vpop.f32.mrf.mxu3 }
 0x167   :  { %v913_v49 = vadd.f32 %v894_v47, %v632_v45  ;;  %v914_v50 = vadd.f32 %v907_v48, %v645_v46  ;;  %v870_v51 = vpop.f32.mrf.mxu0  ;;  %v883_v52 = vpop.f32.mrf.mxu1 }
 0x169   :  { %1725 = vtanh.f32 %v913_v49  ;;  %v924_v53 = vmul.f32 0.5, %v914_v50 }
 0x16a   :  { %v1722_v54 = vpop.eup %1721 }
 0x16b   :  { %v1724_v55 = vpop.eup %1723  ;;  %v917_v56 = vadd.f32 1.0, %v1722_v54  ;;  %1727 = vtanh.f32 %v924_v53 }
 0x16c   :  { %v921_v57 = vadd.f32 1.0, %v1724_v55 }
 0x16d   :  { %v918_v58 = vmul.f32 0.5, %v917_v56 }
 0x16e   :  { %v922_v59 = vmul.f32 0.5, %v921_v57  ;;  %v896_v60 = vpop.f32.mrf.mxu2  ;;  %v909_v61 = vpop.f32.mrf.mxu3 }
 0x16f   :  { %v1726_v62 = vpop.eup %1725  ;;  %v1010_v63 = vpop.f32.mrf.mxu0 }
 0x170   :  { %v928_v0 = vmul.f32 %v922_v59, %v2072_v10  ;;  %v929_v1 = vmul.f32 %v1726_v62, %v918_v58  ;;  %v1011_v2 = vadd.f32 %v1709_v28, %v1010_v63  ;;  %v1710_v10 = vld [vmem:[%s2100_s8] ss:$0 sm:$0xff] }
 0x171   :  { %v1728_v3 = vpop.eup %1727 }
 0x172   :  { %v930_v4 = vadd.f32 %v929_v1, %v928_v0  ;;  %1014 = vst [vmem:[#allocation14] sm:$0xff] %v1011_v2  ;;  %v926_v5 = vadd.f32 1.0, %v1728_v3 }
 0x173   :  { %1108 = dma.vmem_to_hbm [thread:$0]  %s1104_s28, 128, %s1106_s3, [#allocation4]  }
 0x174   :  { %1729 = vtanh.f32 %v930_v4  ;;  %v927_v7 = vmul.f32 0.5, %v926_v5 }
 0x177   :  { %v1012_v6 = vpop.f32.mrf.mxu0 }
 0x17a   :  { %v1730_v8 = vpop.eup %1729 }
 0x17b   :  { %v932_v9 = vmul.f32 %v1730_v8, %v927_v7 }
 0x17d   :  { %v1015_v11 = vpack.c.bf16 %v932_v9, %v932_v9 }
 0x17f   :  { %1092 = vmatmul.bf16.vlgmr.msrb.gmra.mxu1 %v1015_v11 }
 0x1fc   :  { %v1093_v12 = vpop.f32.mrf.mxu1 }
 0x1fd   :  { %v1094_v13 = vadd.f32 %v1710_v10, %v1093_v12 }
 0x1ff   :  { %1097 = vst [vmem:[#allocation15] sm:$0xff] %v1094_v13 }
 0x200   :  { %1119 = dma.vmem_to_hbm [thread:$0]  %s1115_s13, 128, %s1117_s16, [#allocation16]  }
 0x204   :  { %v1095_v14 = vpop.f32.mrf.mxu1 }
 0x205   :  { %1955 = dma.done.wait [#allocation4], 128  }
 0x206   :  { %1956 = vsyncadd [#allocation4], 4294967168 }
 0x207   :  { %1957 = dma.done.wait [#allocation16], 128  }
 0x208   :  { %1958 = vsyncadd [#allocation16], 4294967168 }
 0x209   :  { %1128 = vsyncpa [#allocation3], 1 }
 0x20a   :  { %1129 = vsyncpa [#allocation6], 1 }
 0x20b   :  { %1130 = vsyncpa [#allocation9], 1 }
 0x20c   :  { %1131 = vsyncpa [#allocation12], 1 }
 0x20d   :  { %1132 = vsyncpa [#allocation4], 1 }
 0x20e   :  { %1133 = vsyncpa [#allocation16], 1 }

</bundles_post_ra>
